<compile_context>
chip_gen: v6e
topology: v6e:2x2x1
jax: 0.10.0
libtpu: 0.0.40
codegen_flags: <defaults>
</compile_context>

<pallas_src>
import functools

import jax
import jax.numpy as jnp
from jax import lax
from jax.experimental import pallas as pl
from jax.experimental.pallas import tpu as pltpu


# ---------------------------------------------------------------------------
# helpers
# ---------------------------------------------------------------------------
def _round_up(x, m):
    return (x + m - 1) // m * m


def _vmem_budget():
    """~70% of physical VMEM, capped at 100 MiB (v7x ~44 MiB, v5e/v6e ~90 MiB)."""
    try:
        cap = int(pltpu.get_tpu_info().vmem_capacity_bytes)
    except Exception:
        cap = 64 << 20
    return int(min(cap * 0.7, 100 << 20))


def _pick_tp(p, kk, cout, budget):
    """Spatial (P) tile for the conv matmul.

    Full P when it fits the VMEM budget with the whole K reduction resident;
    otherwise a multiple of 256 (P is padded up to a tile multiple outside —
    padded patch rows are all-zero, so they contribute nothing to the fused
    InstanceNorm sums and are sliced off afterwards)."""
    fixed = 2 * kk * cout * 2 + cout * 4 + 4 * cout * 4 + (4 << 20)
    per_row = 2 * kk * 2 + 2 * cout * 2           # bf16 patches + bf16 y, 2x buffered
    avail = max(budget - fixed, per_row * 256)
    tp = min(int(avail // per_row), 4096)
    if tp >= p:
        return p, 1
    tp = max(256, (tp // 256) * 256)
    if tp >= p:
        return p, 1
    return tp, -(-p // tp)


# ---------------------------------------------------------------------------
# Kernel 1: conv matmul (full K resident) + bias + LeakyReLU  (no InstanceNorm)
# ---------------------------------------------------------------------------
def _mm_bias_kernel(p_ref, w_ref, b_ref, o_ref, *, slope):
    y = jnp.dot(p_ref[0], w_ref[...], preferred_element_type=jnp.float32)
    y = y + b_ref[...]
    if slope is not None:
        y = jnp.where(y >= 0, y, slope * y)
    o_ref[0] = y.astype(o_ref.dtype)


# ---------------------------------------------------------------------------
# Kernel 2: conv matmul (full K resident) + fused InstanceNorm statistics.
# Bias is dropped (cancels exactly under affine=False InstanceNorm2d).
# mean_ref / rstd_ref are resident accumulators over the spatial-tile axis.
# ---------------------------------------------------------------------------
def _mm_norm_kernel(p_ref, w_ref, y_ref, mean_ref, rstd_ref, *, inv_p, eps):
    j = pl.program_id(1)

    @pl.when(j == 0)
    def _():
        mean_ref[...] = jnp.zeros_like(mean_ref)
        rstd_ref[...] = jnp.zeros_like(rstd_ref)

    y = jnp.dot(p_ref[0], w_ref[...], preferred_element_type=jnp.float32)
    y_ref[0] = y.astype(y_ref.dtype)
    mean_ref[0] += jnp.sum(y, axis=0, keepdims=True)
    rstd_ref[0] += jnp.sum(y * y, axis=0, keepdims=True)

    @pl.when(j == pl.num_programs(1) - 1)
    def _():
        s = mean_ref[0]
        ss = rstd_ref[0]
        m = s * inv_p
        # E[x^2] - E[x]^2 in f32, clamped; acceptable for discriminator activations.
        var = jnp.maximum(ss * inv_p - m * m, 0.0)
        mean_ref[0] = m
        rstd_ref[0] = lax.rsqrt(var + eps)


# ---------------------------------------------------------------------------
# Kernel 3: InstanceNorm apply + LeakyReLU (reads bf16 y, writes bf16)
# ---------------------------------------------------------------------------
def _in_apply_kernel(y_ref, mean_ref, rstd_ref, o_ref, *, slope):
    y = y_ref[0].astype(jnp.float32)
    o = (y - mean_ref[0]) * rstd_ref[0]
    if slope is not None:
        o = jnp.where(o >= 0, o, slope * o)
    o_ref[0] = o.astype(o_ref.dtype)


# ---------------------------------------------------------------------------
# Kernel 4: Cout=1 head conv as VPU broadcast-multiply + lane reduction
# (avoids padding the weight to 128 columns / a mostly-empty MXU pass)
# ---------------------------------------------------------------------------
def _head_kernel(p_ref, w_ref, b_ref, o_ref):
    p = p_ref[...].astype(jnp.float32)          # (tm, KK)
    w = w_ref[...].astype(jnp.float32)          # (1, KK)
    r = jnp.sum(p * w, axis=1, keepdims=True) + b_ref[...]
    o_ref[...] = r.astype(o_ref.dtype)


# ---------------------------------------------------------------------------
# im2col glue (bf16 patches; reshape/slice only, no math)
# ---------------------------------------------------------------------------
def _extract_patches(x, k, stride, pad):
    # x: (N, H, W, C) -> (N, Ho*Wo, k*k*C), flatten order (kh, kw, c)
    if pad:
        x = jnp.pad(x, ((0, 0), (pad, pad), (pad, pad), (0, 0)))
    n, hp, wp, c = x.shape
    ho = (hp - k) // stride + 1
    wo = (wp - k) // stride + 1
    cols = []
    for kh in range(k):
        for kw in range(k):
            cols.append(
                x[:, kh:kh + stride * (ho - 1) + 1:stride,
                     kw:kw + stride * (wo - 1) + 1:stride, :]
            )
    patches = jnp.stack(cols, axis=3).reshape(n, ho * wo, k * k * c)
    return patches, ho, wo


# ---------------------------------------------------------------------------
# One discriminator block: Conv2d(k=4,s=2,p=1) [+ InstanceNorm] + LeakyReLU
# ---------------------------------------------------------------------------
def conv_block(x, w, b, *, stride, pad, normalize, leaky_slope):
    cout, cin, k, _ = w.shape
    patches, ho, wo = _extract_patches(x.astype(jnp.bfloat16), k, stride, pad)
    n, p, kk = patches.shape

    # PyTorch weight (Cout, Cin, kh, kw) -> (kh, kw, Cin, Cout) -> (KK, Cout)
    wf = jnp.transpose(w, (2, 3, 1, 0)).reshape(kk, cout).astype(jnp.bfloat16)
    bf = b.astype(jnp.float32).reshape(1, cout)

    budget = _vmem_budget()
    tp, num_p = _pick_tp(p, kk, cout, budget)
    p_pad = tp * num_p
    if p_pad != p:
        patches = jnp.pad(patches, ((0, 0), (0, p_pad - p), (0, 0)))

    if normalize:
        y, mean, rstd = pl.pallas_call(
            functools.partial(_mm_norm_kernel, inv_p=1.0 / p, eps=1e-5),
            out_shape=(jax.ShapeDtypeStruct((n, p_pad, cout), jnp.bfloat16),
                       jax.ShapeDtypeStruct((n, 1, cout), jnp.float32),
                       jax.ShapeDtypeStruct((n, 1, cout), jnp.float32)),
            grid_spec=pltpu.PrefetchScalarGridSpec(
                num_scalar_prefetch=0,
                grid=(n, num_p),
                in_specs=[
                    pl.BlockSpec((1, tp, kk), lambda i, j: (i, j, 0)),
                    pl.BlockSpec((kk, cout), lambda i, j: (0, 0)),   # resident weight
                ],
                out_specs=(
                    pl.BlockSpec((1, tp, cout), lambda i, j: (i, j, 0)),
                    pl.BlockSpec((1, 1, cout), lambda i, j: (i, 0, 0)),
                    pl.BlockSpec((1, 1, cout), lambda i, j: (i, 0, 0)),
                ),
            ),
            compiler_params=pltpu.CompilerParams(
                dimension_semantics=("parallel", "arbitrary"),
                vmem_limit_bytes=budget,
            ),
        )(patches, wf)

        y = pl.pallas_call(
            functools.partial(_in_apply_kernel, slope=leaky_slope),
            out_shape=jax.ShapeDtypeStruct((n, p_pad, cout), jnp.bfloat16),
            grid_spec=pltpu.PrefetchScalarGridSpec(
                num_scalar_prefetch=0,
                grid=(n, num_p),
                in_specs=[
                    pl.BlockSpec((1, tp, cout), lambda i, j: (i, j, 0)),
                    pl.BlockSpec((1, 1, cout), lambda i, j: (i, 0, 0)),
                    pl.BlockSpec((1, 1, cout), lambda i, j: (i, 0, 0)),
                ],
                out_specs=pl.BlockSpec((1, tp, cout), lambda i, j: (i, j, 0)),
            ),
            compiler_params=pltpu.CompilerParams(
                dimension_semantics=("parallel", "parallel"),
                vmem_limit_bytes=budget,
            ),
        )(y, mean, rstd)
    else:
        y = pl.pallas_call(
            functools.partial(_mm_bias_kernel, slope=leaky_slope),
            out_shape=jax.ShapeDtypeStruct((n, p_pad, cout), jnp.bfloat16),
            grid_spec=pltpu.PrefetchScalarGridSpec(
                num_scalar_prefetch=0,
                grid=(n, num_p),
                in_specs=[
                    pl.BlockSpec((1, tp, kk), lambda i, j: (i, j, 0)),
                    pl.BlockSpec((kk, cout), lambda i, j: (0, 0)),   # resident weight
                    pl.BlockSpec((1, cout), lambda i, j: (0, 0)),
                ],
                out_specs=pl.BlockSpec((1, tp, cout), lambda i, j: (i, j, 0)),
            ),
            compiler_params=pltpu.CompilerParams(
                dimension_semantics=("parallel", "parallel"),
                vmem_limit_bytes=budget,
            ),
        )(patches, wf, bf)

    if p_pad != p:
        y = y[:, :p, :]
    return y.reshape(n, ho, wo, cout)


# ---------------------------------------------------------------------------
# Final Conv2d(512, 1, 4, stride=1, padding=1): Cout=1 special case
# ---------------------------------------------------------------------------
def head_conv(x, w, b):
    cout, cin, k, _ = w.shape                     # cout == 1
    patches, ho, wo = _extract_patches(x.astype(jnp.bfloat16), k, stride=1, pad=1)
    n, p, kk = patches.shape
    m = n * p
    pm = patches.reshape(m, kk)

    wf = jnp.transpose(w, (2, 3, 1, 0)).reshape(1, kk).astype(jnp.bfloat16)
    bf = b.astype(jnp.float32).reshape(1, 1)

    tm = min(128, _round_up(m, 16))
    m_pad = _round_up(m, tm)
    if m_pad != m:
        pm = jnp.pad(pm, ((0, m_pad - m), (0, 0)))

    out = pl.pallas_call(
        _head_kernel,
        out_shape=jax.ShapeDtypeStruct((m_pad, 1), jnp.float32),
        grid_spec=pltpu.PrefetchScalarGridSpec(
            num_scalar_prefetch=0,
            grid=(m_pad // tm,),
            in_specs=[
                pl.BlockSpec((tm, kk), lambda i: (i, 0)),
                pl.BlockSpec((1, kk), lambda i: (0, 0)),
                pl.BlockSpec((1, 1), lambda i: (0, 0)),
            ],
            out_specs=pl.BlockSpec((tm, 1), lambda i: (i, 0)),
        ),
        compiler_params=pltpu.CompilerParams(
            dimension_semantics=("parallel",),
            vmem_limit_bytes=_vmem_budget(),
        ),
    )(pm, wf, bf)
    return out[:m].reshape(n, ho, wo, 1)


# ---------------------------------------------------------------------------
# Parameters (deterministic, PyTorch Conv2d-style uniform fan-in init)
# ---------------------------------------------------------------------------
def init_params(key, channels):
    specs = [(channels, 64), (64, 128), (128, 256), (256, 512), (512, 1)]
    params = []
    for cin, cout in specs:
        key, kw_, kb_ = jax.random.split(key, 3)
        scale = 1.0 / jnp.sqrt(float(cin * 4 * 4))
        w = jax.random.uniform(kw_, (cout, cin, 4, 4), jnp.float32, -scale, scale)
        b = jax.random.uniform(kb_, (cout,), jnp.float32, -scale, scale)
        params.append((w, b))
    return params


# ---------------------------------------------------------------------------
# Full forward pass, mirroring the nn.Sequential in Discriminator
# ---------------------------------------------------------------------------
def discriminator_forward(img_nchw, params):
    # img_nchw: (N, C, H, W) -> NHWC internally
    x = jnp.transpose(img_nchw, (0, 2, 3, 1)).astype(jnp.float32)
    (w1, b1), (w2, b2), (w3, b3), (w4, b4), (w5, b5) = params

    x = conv_block(x, w1, b1, stride=2, pad=1, normalize=False, leaky_slope=0.2)
    x = conv_block(x, w2, b2, stride=2, pad=1, normalize=True,  leaky_slope=0.2)
    x = conv_block(x, w3, b3, stride=2, pad=1, normalize=True,  leaky_slope=0.2)
    x = conv_block(x, w4, b4, stride=2, pad=1, normalize=True,  leaky_slope=0.2)

    # nn.ZeroPad2d((1, 0, 1, 0)): pad left=1, right=0, top=1, bottom=0
    x = jnp.pad(x, ((0, 0), (1, 0), (1, 0), (0, 0)))

    # final Conv2d(512, 1, 4, padding=1), no norm, no activation
    x = head_conv(x, w5, b5)

    # back to NCHW: (N, 1, H//16, W//16)
    return jnp.transpose(x, (0, 3, 1, 2))


if __name__ == "__main__":
    key = jax.random.PRNGKey(0)
    k_img, k_params = jax.random.split(key)

    N, C, H, W = 2, 3, 16, 16
    img = jax.random.normal(k_img, (N, C, H, W), dtype=jnp.float32)
    params = init_params(k_params, C)

    out = discriminator_forward(img, params)
    out = jax.block_until_ready(out)

    expected = (N, 1, H // 2 ** 4, W // 2 ** 4)
    assert out.shape == expected, (out.shape, expected)
    assert out.dtype == jnp.float32
    print("KERNEL_OK")
</pallas_src>

<mosaic_0001>
module attributes {stable_mosaic.version = 11 : i64} {
  func.func @_mm_bias_kernel(%arg0: i32, %arg1: i32, %arg2: memref<1x64x48xbf16, #tpu.memory_space<vmem>>, %arg3: memref<48x64xbf16, #tpu.memory_space<vmem>>, %arg4: memref<1x64xf32, #tpu.memory_space<vmem>>, %arg5: memref<1x64x64xbf16, #tpu.memory_space<vmem>>) attributes {dimension_semantics = [#tpu.dimension_semantics<parallel>, #tpu.dimension_semantics<parallel>], iteration_bounds = array<i64: 2, 1>, scalar_prefetch = 0 : i64, scratch_operands = 0 : i64, tpu.core_type = #tpu.core_type<tc>, window_params = [{transform_indices = @transform_0, window_bounds = array<i64: 1, 64, 48>}, {pipeline_mode = #tpu.pipeline_mode<synchronous>, transform_indices = @transform_1, window_bounds = array<i64: 48, 64>}, {pipeline_mode = #tpu.pipeline_mode<synchronous>, transform_indices = @transform_2, window_bounds = array<i64: 1, 64>}, {transform_indices = @transform_3, window_bounds = array<i64: 1, 64, 64>}]} {
    %c0 = arith.constant 0 : index
    %c0_0 = arith.constant 0 : index
    %c0_1 = arith.constant 0 : index
    %0 = vector.load %arg2[%c0, %c0_0, %c0_1] : memref<1x64x48xbf16, #tpu.memory_space<vmem>>, vector<1x64x48xbf16>
    %1 = vector.shape_cast %0 : vector<1x64x48xbf16> to vector<64x48xbf16>
    %c0_2 = arith.constant 0 : index
    %c0_3 = arith.constant 0 : index
    %2 = vector.load %arg3[%c0_2, %c0_3] : memref<48x64xbf16, #tpu.memory_space<vmem>>, vector<48x64xbf16>
    %cst = arith.constant dense<0.000000e+00> : vector<64x64xf32>
    %3 = tpu.matmul %1, %2, %cst {dimension_numbers = #tpu.dot_dimension_numbers<[1], [0], [0], [1], [0, 0, 1, 1], [], []>} : vector<64x48xbf16>, vector<48x64xbf16>, vector<64x64xf32> -> vector<64x64xf32>
    %c0_4 = arith.constant 0 : index
    %c0_5 = arith.constant 0 : index
    %4 = vector.load %arg4[%c0_4, %c0_5] : memref<1x64xf32, #tpu.memory_space<vmem>>, vector<1x64xf32>
    %5 = vector.broadcast %4 : vector<1x64xf32> to vector<64x64xf32>
    %6 = arith.addf %3, %5 : vector<64x64xf32>
    %cst_6 = arith.constant 0.000000e+00 : f32
    %7 = vector.broadcast %cst_6 : f32 to vector<64x64xf32>
    %8 = arith.cmpf oge, %6, %7 : vector<64x64xf32>
    %cst_7 = arith.constant 2.000000e-01 : f32
    %9 = vector.broadcast %cst_7 : f32 to vector<64x64xf32>
    %10 = arith.mulf %9, %6 : vector<64x64xf32>
    %11 = arith.select %8, %6, %10 : vector<64x64xi1>, vector<64x64xf32>
    %12 = arith.truncf %11 : vector<64x64xf32> to vector<64x64xbf16>
    %c0_8 = arith.constant 0 : index
    %c0_9 = arith.constant 0 : index
    %c0_10 = arith.constant 0 : index
    %13 = vector.load %arg5[%c0_8, %c0_9, %c0_10] : memref<1x64x64xbf16, #tpu.memory_space<vmem>>, vector<1x64x64xbf16>
    %14 = vector.shape_cast %13 : vector<1x64x64xbf16> to vector<64x64xbf16>
    %15 = vector.shape_cast %12 : vector<64x64xbf16> to vector<1x64x64xbf16>
    tpu.vector_store %arg5[%c0_8, %c0_9, %c0_10], %15 {strides = array<i32>} : memref<1x64x64xbf16, #tpu.memory_space<vmem>>, vector<1x64x64xbf16>,
    return
  }
  func.func @transform_0(%arg0: i32, %arg1: i32) -> (i32, i32, i32) {
    %c0_i32 = arith.constant 0 : i32
    %c0_i32_0 = arith.constant 0 : i32
    return %arg0, %arg1, %c0_i32 : i32, i32, i32
  }
  func.func @transform_1(%arg0: i32, %arg1: i32) -> (i32, i32) {
    %c0_i32 = arith.constant 0 : i32
    %c0_i32_0 = arith.constant 0 : i32
    %c0_i32_1 = arith.constant 0 : i32
    return %c0_i32, %c0_i32_0 : i32, i32
  }
  func.func @transform_2(%arg0: i32, %arg1: i32) -> (i32, i32) {
    %c0_i32 = arith.constant 0 : i32
    %c0_i32_0 = arith.constant 0 : i32
    %c0_i32_1 = arith.constant 0 : i32
    return %c0_i32, %c0_i32_0 : i32, i32
  }
  func.func @transform_3(%arg0: i32, %arg1: i32) -> (i32, i32, i32) {
    %c0_i32 = arith.constant 0 : i32
    %c0_i32_0 = arith.constant 0 : i32
    return %arg0, %arg1, %c0_i32 : i32, i32, i32
  }
}

</mosaic_0001>

<bundles_post_ra>
// kernel: tpu_custom_call.1
= control target key start
LH: loop header
LB: loop body
LE: loop exit
PB: predicated region body
PF: predicated region fallthrough
CT: control target
= control target key end

     0   :  { %8 = vsyncpa [#allocation3], 0  ;;  %s882_s0 = inlined_call_operand.vmem [shape: bf16[2,64,48], index: 0, kind: input, shape index: {}]   ;;  %s883_s1 = inlined_call_operand.vmem [shape: bf16[48,64], index: 1, kind: input, shape index: {}]   ;;  %s884_s2 = inlined_call_operand.vmem [shape: f32[1,64], index: 2, kind: input, shape index: {}]   ;;  %s885_s3 = inlined_call_operand.hbm [shape: bf16[2,64,64], index: 3, kind: output, shape index: {}]  }
   0x1   :  { %10 = vsyncpa [#allocation3 + $0x1], 0  ;;  %s733_s12 = smov 0   ;;  %s735_s13 = smov 0  }
   0x2   :  { %s737_s14 = smov 0   ;;  %s739_s15 = smov 0  }
   0x3   :  { %s741_s16 = smov 0   ;;  %s743_s17 = smov 0  }
   0x4 LB: > { %s498_s18 = sadd.s32 4294967295, %s708_s17   ;;  %s499_s19 = sadd.s32 4294967294, %s708_s17   ;;  %s708_s17 = sphi %s743_s17, %s16_s17   ;;  %s704_s16 = sphi %s741_s16, %s892_s16   ;;  %s700_s15 = sphi %s739_s15, %s891_s15   ;;  %s696_s14 = sphi %s737_s14, %s890_s14   ;;  %s692_s13 = sphi %s735_s13, %s889_s13   ;;  %s688_s12 = sphi %s733_s12, %s888_s12  }
   0x5   : > { %s28_s20 = sadd.s32 1, %s704_s16  ;;  %s107_s21 = sadd.s32 1, %s696_s14 }
   0x6   : > { %p30_p0 = scmp.ge.s32.totalorder %s28_s20, 2  ;;  %p117_p1 = scmp.ne.s32.totalorder %s696_s14, %s692_s13 }
   0x7   : > { %p118_p2 = scmp.eq.s32.totalorder %s498_s18, 1  ;;  %p123_p3 = scmp.ne.s32.totalorder %s692_s13, %s688_s12 }
   0x8   : > { %s894_s20 = smov (%p30_p0, %s28_s20), 0  ;;  %p124_p5 = scmp.eq.s32.totalorder %s499_s19, 1 }
   0x9   : > { %p773_p4 = por %p118_p2, %p117_p1  ;;  %s102_s23 = ssub.s32 %s704_s16, %s894_s20 }
   0xa   : > { %p502_p6 = scmp.ge.s32.totalorder %s708_s17, 1  ;;  %p105_p7 = scmp.eq.s32.totalorder %s102_s23, 0 }
   0xb   : > { %p780_p8 = por %p124_p5, %p123_p3  ;;  %p161_p9 = scmp.lt.s32.totalorder %s708_s17, 3 }
   0xc   : > { %s786_s25 = scalar_select %p105_p7, %s696_s14, %s107_s21  }
   0xd   : > { %p162_p10 = pnand %p502_p6, %p161_p9 }
   0xe   : > { %p190_p11 = scmp.lt.s32.totalorder (!%p162_p10), %s700_s15, 1  ;;  %s186_s18 = sand.u32 (!%p162_p10), 1, %s692_s13  }
   0xf   : > { %165 = sbr.rel (%p162_p10) target bundleno = 255 (0xff), region = 32  ;;  %s503_s19 = sshll.u32 (!%p162_p10), %s186_s18, 5 }
  0x10   : > { %s808_s21 = scalar_lea.vmem (!%p162_p10), [#allocation2], %s503_s19  ;;  %s540_s23 = sshll.u32 (!%p162_p10), %s700_s15, 9 }
  0x11   : > { %s419_s26 = sshll.u32 (!%p162_p10), %s808_s21, 4  ;;  %s827_s28 = scalar_lea.hbm (!%p162_p10), %s885_s3, %s540_s23  ;;  %s829_s26 = int_to_ptr.vmem [resolvable:$true] %s419_s26 }
  0x12   : > { %s837_s29 = scalar_lea.sflag (!%p162_p10), [#allocation3], %s186_s18  ;;  %s710_s4 = smov (!%p162_p10), [#allocation2]  }
  0x13   : > { %s636_s5 = sshll.u32 (!%p162_p10), %s710_s4, 4  ;;  %s637_s5 = int_to_ptr.vmem [resolvable:$false] %s636_s5 }
  0x14   : > { %v625_v0 = vld [vmem:[%s883_s1 + $0x10] sm:$0xff]   ;;  %v626_v1 = vld [vmem:[%s883_s1 + $0x8] sm:$0xff]   ;;  %s191_s30 = scalar_select %p190_p11, %s700_s15, 1  ;;  %v627_v2 = vld [vmem:[%s883_s1] sm:$0xff]   ;;  %vm260_vm0 = vcmask 392192   ;;  %vm394_vm3 = vcmask 519168  }
  0x15   : > { %548 = vmatprep.subr.bf16.mxu0 %v625_v0  ;;  %562 = vmatprep.subr.bf16.mxu1 %v625_v0  ;;  %v506_v7 = vld [vmem:[%s884_s2] ss:$0 sm:$0xff]  ;;  %p639_p1 = scmp.lt.s32.totalorder %s829_s26, %s637_s5 }
  0x16   : > { %549 = vmatpush3.bf16.msra.mxu0 %v625_v0  ;;  %565 = vmatpush3.bf16.msra.mxu1 %v625_v0  ;;  %s531_s6 = sshll.u32 %s191_s30, 5  ;;  %s632_s30 = scalar_lea.vmem %s829_s26, 512 }
  0x17   : > { %550 = vmatprep.subr.bf16.mxu0 %v626_v1  ;;  %563 = vmatprep.subr.bf16.mxu1 %v626_v1  ;;  %s197_s9 = scalar_lea.vmem %s882_s0, %s531_s6  ;;  %p633_p12 = scmp.ne.s32.totalorder %s829_s26, %s632_s30 }
  0x18   : > { %v628_v3 = vld [vmem:[%s197_s9] sm:$0xff]   ;;  %v629_v4 = vld [vmem:[%s197_s9 + $0x10] sm:$0xff]   ;;  %v630_v5 = vld [vmem:[%s197_s9 + $0x8] sm:$0xff]   ;;  %s638_s6 = scalar_lea.vmem %s637_s5, 1024 }
  0x19   : > { %554 = vmatprep.mubr.msk.bf16.mxu0 %vm260_vm0, %v628_v3  ;;  %558 = vmatprep.mubr.msk.bf16.mxu1 %vm260_vm0, %v629_v4  ;;  %v631_v6 = vld [vmem:[%s197_s9 + $0x18] sm:$0xff]   ;;  %p634_p13 = pnand %p633_p12, %p773_p4  ;;  %p640_p2 = scmp.lt.s32.totalorder %s638_s6, %s632_s30 }
  0x1a   : > { %551 = vmatpush3.bf16.msra.mxu0 %v626_v1  ;;  %566 = vmatpush3.bf16.msra.mxu1 %v626_v1 }
  0x1b   : > { %552 = vmatprep.subr.bf16.mxu0 %v627_v2  ;;  %564 = vmatprep.subr.bf16.mxu1 %v627_v2  ;;  %p635_p0 = pneg %p634_p13  ;;  %p641_p3 = por %p640_p2, %p639_p1 }
  0x1d   : > { %p642_p5 = pnand %p641_p3, %p635_p0 }
  0x1e   : > { %553 = vmatpush3.bf16.msra.mxu0 %v627_v2  ;;  %567 = vmatpush3.bf16.msra.mxu1 %v627_v2 }
  0x21   : > { %555 = vmatmul.mubr.msk.bf16.vlgmr.msra.gmra.mxu0 %vm260_vm0, %v630_v5  ;;  %559 = vmatmul.mubr.msk.bf16.vlgmr.msra.gmra.mxu1 %vm260_vm0, %v631_v6 }
  0xe1   : > { %v556_v8 = vpop.f32.mrf.mxu0  ;;  %v560_v9 = vpop.f32.mrf.mxu1 }
  0xe2   : > { %v316_v10 = vadd.f32 %v556_v8, %v506_v7  ;;  %v332_v11 = vadd.f32 %v560_v9, %v506_v7 }
  0xe3   : > { %v307_v12 = vpop.f32.mrf.mxu0  ;;  %v323_v13 = vpop.f32.mrf.mxu1 }
  0xe4   : > { %vm340_vm1 = vcmp.ge.f32.partialorder %v316_v10, 0.0  ;;  %v348_v14 = vmul.f32 0.2, %v316_v10  ;;  %vm344_vm2 = vcmp.ge.f32.partialorder %v332_v11, 0.0  ;;  %v352_v15 = vmul.f32 0.2, %v332_v11 }
  0xe5   : > { %v308_v16 = vadd.f32 %v506_v7, %v307_v12  ;;  %v324_v17 = vadd.f32 %v506_v7, %v323_v13  ;;  %v557_v18 = vpop.f32.mrf.mxu0  ;;  %v561_v19 = vpop.f32.mrf.mxu1 }
  0xe6   : > { %v356_v20 = vsel %vm340_vm1, %v316_v10, %v348_v14  ;;  %v360_v21 = vsel %vm344_vm2, %v332_v11, %v352_v15  ;;  %v319_v22 = vadd.f32 %v557_v18, %v506_v7  ;;  %v335_v23 = vadd.f32 %v561_v19, %v506_v7 }
  0xe7   : > { %v534_v24 = vpack.c.bf16 %v356_v20, %v356_v20  ;;  %v538_v25 = vpack.c.bf16 %v360_v21, %v360_v21  ;;  %vm338_vm4 = vcmp.ge.f32.partialorder %v308_v16, 0.0  ;;  %v346_v26 = vmul.f32 0.2, %v308_v16  ;;  %v310_v27 = vpop.f32.mrf.mxu0  ;;  %v326_v28 = vpop.f32.mrf.mxu1 }
  0xe8   : > { %vm342_vm5 = vcmp.ge.f32.partialorder %v324_v17, 0.0  ;;  %v350_v29 = vmul.f32 0.2, %v324_v17  ;;  %vm341_vm6 = vcmp.ge.f32.partialorder %v319_v22, 0.0  ;;  %v349_v30 = vmul.f32 0.2, %v319_v22 }
  0xe9   : > { %397 = vst.msk [vmem:[%s808_s21 + $0x8] sm:$0xf] %vm394_vm3, %v534_v24  ;;  %401 = vst.msk [vmem:[%s808_s21 + $0x18] sm:$0xf] %vm394_vm3, %v538_v25  ;;  %v354_v31 = vsel %vm338_vm4, %v308_v16, %v346_v26  ;;  %vm345_vm7 = vcmp.ge.f32.partialorder %v335_v23, 0.0  ;;  %v311_v33 = vadd.f32 %v506_v7, %v310_v27  ;;  %v327_v37 = vadd.f32 %v506_v7, %v326_v28 }
  0xea   : > { %v353_v32 = vmul.f32 0.2, %v335_v23  ;;  %v532_v34 = vpack.c.bf16 %v354_v31, %v354_v31  ;;  %v358_v35 = vsel %vm342_vm5, %v324_v17, %v350_v29  ;;  %v357_v36 = vsel %vm341_vm6, %v319_v22, %v349_v30 }
  0xeb   : > { %v536_v38 = vpack.c.bf16 %v358_v35, %v358_v35  ;;  %v535_v39 = vpack.c.bf16 %v357_v36, %v357_v36  ;;  %vm339_vm8 = vcmp.ge.f32.partialorder %v311_v33, 0.0  ;;  %v347_v42 = vmul.f32 0.2, %v311_v33 }
  0xec   : > { %v361_v40 = vsel %vm345_vm7, %v335_v23, %v353_v32  ;;  %395 = vst.msk [vmem:[%s808_s21] sm:$0xf] %vm394_vm3, %v532_v34  ;;  %vm343_vm9 = vcmp.ge.f32.partialorder %v327_v37, 0.0  ;;  %v351_v43 = vmul.f32 0.2, %v327_v37 }
  0xed   : > { %v539_v41 = vpack.c.bf16 %v361_v40, %v361_v40  ;;  %399 = vst.msk [vmem:[%s808_s21 + $0x10] sm:$0xf] %vm394_vm3, %v536_v38  ;;  %398 = vst.msk [vmem:[%s808_s21 + $0xc] sm:$0xf] %vm394_vm3, %v535_v39  ;;  %v355_v44 = vsel %vm339_vm8, %v311_v33, %v347_v42 }
  0xee   : > { %v359_v45 = vsel %vm343_vm9, %v327_v37, %v351_v43  ;;  %v533_v46 = vpack.c.bf16 %v355_v44, %v355_v44 }
  0xef   : > { %402 = vst.msk [vmem:[%s808_s21 + $0x1c] sm:$0xf] %vm394_vm3, %v539_v41  ;;  %v537_v47 = vpack.c.bf16 %v359_v45, %v359_v45 }
  0xf0   : > { %396 = vst.msk [vmem:[%s808_s21 + $0x4] sm:$0xf] %vm394_vm3, %v533_v46 }
  0xf1   : > { %400 = vst.msk [vmem:[%s808_s21 + $0x14] sm:$0xf] %vm394_vm3, %v537_v47 }
  0xf2   : > { %645 = shalt.err (!%p642_p5)
}
  0xf3   : > { %s646_s7 = scalar_lea.hbm %s827_s28, 512  ;;  %s650_s10 = scalar_lea.hbm %s885_s3, 1024 }
  0xf4   : > { %p647_p6 = scmp.ne.s32.totalorder %s827_s28, %s646_s7  ;;  %p651_p10 = scmp.lt.s32.totalorder %s827_s28, %s885_s3 }
  0xf5   : > { %p652_p11 = scmp.lt.s32.totalorder %s650_s10, %s646_s7 }
  0xf6   : > { %p648_p7 = pnand %p647_p6, %p773_p4 }
  0xf7   : > { %p653_p12 = por %p652_p11, %p651_p10 }
  0xf8   : > { %p649_p9 = pneg %p648_p7 }
  0xfa   : > { %p654_p13 = pnand %p653_p12, %p649_p9 }
  0xfc   : > { %657 = shalt.err (!%p654_p13)
}
  0xfd   : > { %s711_s19 = smov 64   ;;  %s712_s21 = smov 4  }
  0xfe   : > { %568 = dma.vmem_to_hbm [thread:$0]  (%p773_p4), %s829_s26, 512, %s827_s28, %s837_s29, %s711_s19, %s711_s19, %s712_s21  }
  0xff PF: > { %p574_p0 = scmp.ge.s32.totalorder %s708_s17, 2  ;;  %s434_s23 = sand.u32 1, %s688_s12  }
 0x100   : > { %s435_s15 = scalar_lea.sflag [#allocation3], %s434_s23 }
 0x101   : > { %p571_p1 = pnand %p574_p0, %p780_p8 }
 0x103   : > { %p572_p2 = pneg %p571_p1 }
 0x105   : > { %683 = dma.done.wait (%p572_p2), %s435_s15, 512  }
 0x106   : > { %685 = vsyncadd (%p572_p2), %s435_s15, 4294966784  ;;  %s16_s17 = sadd.s32 1, %s708_s17   ;;  %s888_s12 = smov %s692_s13 }
 0x107   : > { %p13_p3 = scmp.ge.s32.totalorder %s16_s17, 4   ;;  %s889_s13 = smov %s696_s14 }
 0x108   : > { %s890_s14 = smov %s786_s25  ;;  %s891_s15 = smov %s704_s16 }
 0x109   : > { %s892_s16 = smov %s894_s20  ;;  %15 = sbr.rel (!%p13_p3) target bundleno = 4 (0x4), region = 67 }
 0x10e   :  { %440 = vsyncpa [#allocation3], 1 }
 0x10f   :  { %442 = vsyncpa [#allocation3 + $0x1], 1 }

</bundles_post_ra>
